<compile_context>
chip_gen: v7x
topology: tpu7x:2x2x1
jax: 0.10.0
libtpu: 0.0.40
codegen_flags: <defaults>
</compile_context>

<pallas_src>
import functools
import math

import jax
import jax.numpy as jnp
from jax.experimental import pallas as pl
from jax.experimental.pallas import tpu as pltpu


_LANE = 128
_SUBLANE = 8


def _round_down(x: int, m: int) -> int:
    return (x // m) * m


def _sublane_multiple(itemsize: int) -> int:
    # Sub-32-bit dtypes pack along sublanes: 8 (f32), 16 (bf16), 32 (int8).
    return max(_SUBLANE, 32 // max(1, itemsize))


@functools.lru_cache(maxsize=None)
def _tpu_params():
    """Returns (vmem_limit_bytes, target_block_bytes, num_cores)."""
    vmem_cap = 64 * 1024 * 1024      # conservative fallback (v7x per-TC VMEM)
    num_cores = 1
    try:
        info = pltpu.get_tpu_info()
        cap = getattr(info, "vmem_capacity_bytes", None)
        if cap:
            vmem_cap = int(cap)
        for attr in ("num_cores", "core_count", "num_tensorcores",
                     "tensorcore_count", "num_tensor_cores"):
            v = getattr(info, attr, None)
            if v:
                try:
                    num_cores = max(1, int(v))
                    break
                except (TypeError, ValueError):
                    pass
    except Exception:
        pass
    vmem_limit = min(vmem_cap // 2, 64 * 1024 * 1024)
    # ~8x headroom per block: 2x(in) + 2x(out) pipelined buffers + f32 temps.
    block_bytes = max(1 * 1024 * 1024, vmem_limit // 8)
    return vmem_limit, block_bytes, num_cores


# ----------------------------- kernels ------------------------------------


def _softmax_lane_kernel(x_ref, o_ref):
    # Softmax over the last (lane) axis of a (tm, N) tile.
    x = x_ref[...].astype(jnp.float32)
    m = jnp.max(x, axis=-1, keepdims=True)
    e = jnp.exp(x - m)
    s = jnp.sum(e, axis=-1, keepdims=True)
    o_ref[...] = (e / s).astype(o_ref.dtype)   # exact divide: hidden under DMA


def _softmax_sublane_kernel(x_ref, o_ref):
    # Softmax over axis=-2 (sublanes) of a (tp, K, tq) tile; lanes stay dense.
    x = x_ref[...].astype(jnp.float32)
    m = jnp.max(x, axis=-2, keepdims=True)
    e = jnp.exp(x - m)
    s = jnp.sum(e, axis=-2, keepdims=True)
    o_ref[...] = (e / s).astype(o_ref.dtype)


def _sigmoid_kernel(x_ref, o_ref):
    # sigmoid(x) = 0.5 * (tanh(x/2) + 1): a single EUP transcendental.
    x = x_ref[...].astype(jnp.float32)
    o_ref[...] = (0.5 * (jnp.tanh(0.5 * x) + 1.0)).astype(o_ref.dtype)


# ----------------------------- tile pickers --------------------------------


def _pick_row_tile(m: int, n: int, itemsize: int, block_bytes: int,
                   num_cores: int) -> int:
    """Row tile for an (M, N) slab reduced over the last axis (full N/block)."""
    sub = _sublane_multiple(itemsize)
    if m <= sub:
        return m  # full extent (allowed even when not a multiple of sub)
    n_lanes = pl.cdiv(n, _LANE) * _LANE
    budget = max(sub, _round_down(block_bytes // max(1, itemsize * n_lanes), sub))
    tm = min(budget, m)
    tm = max(sub, _round_down(tm, sub))
    # Only split for parallelism when the chip actually has >1 TensorCore.
    if num_cores > 1 and tm * 2 > m:
        tm = max(sub, _round_down(pl.cdiv(m, 2), sub))
    return min(tm, m)


def _pick_middle_tiles(p: int, k: int, q: int, itemsize: int,
                       block_bytes: int, num_cores: int):
    """(tp, tq) for a (P, K, Q) slab reduced over K (full K in every block)."""
    sub = _sublane_multiple(itemsize)
    k_pad = pl.cdiv(k, sub) * sub                 # sublane padding of K
    # Lane tile along Q (Q >= _LANE guaranteed by the dispatcher).
    if q <= _LANE:
        tq = q
    else:
        budget_q = max(_LANE,
                       _round_down(block_bytes // max(1, itemsize * k_pad),
                                   _LANE))
        tq = q if budget_q >= q else budget_q
    tq_pad = pl.cdiv(tq, _LANE) * _LANE
    # Batch multiple `pre` entries per block so tiny K*Q maps still move
    # block_bytes-sized DMAs per grid step.
    per_p_bytes = itemsize * k_pad * tq_pad
    tp = max(1, min(p, block_bytes // max(1, per_p_bytes)))
    if num_cores > 1:
        grid_steps = pl.cdiv(p, tp) * pl.cdiv(q, tq)
        if grid_steps < 2:
            if p > 1:
                tp = max(1, pl.cdiv(p, 2))
            elif q > _LANE:
                tq = max(_LANE, _round_down(pl.cdiv(q, 2), _LANE))
    return tp, tq


# ----------------------------- wrappers ------------------------------------


def _softmax_lastdim(x2d: jax.Array) -> jax.Array:
    """Softmax over the last axis of an (M, N) slab (N lane-dense)."""
    M, N = x2d.shape
    vmem_limit, block_bytes, num_cores = _tpu_params()
    itemsize = jnp.dtype(x2d.dtype).itemsize
    tm = _pick_row_tile(M, N, itemsize, block_bytes, num_cores)
    grid = (pl.cdiv(M, tm),)
    return pl.pallas_call(
        _softmax_lane_kernel,
        out_shape=jax.ShapeDtypeStruct((M, N), x2d.dtype),
        grid_spec=pltpu.PrefetchScalarGridSpec(
            num_scalar_prefetch=0,
            grid=grid,
            in_specs=[pl.BlockSpec((tm, N), lambda i: (i, 0))],
            out_specs=pl.BlockSpec((tm, N), lambda i: (i, 0)),
        ),
        compiler_params=pltpu.CompilerParams(
            dimension_semantics=("parallel",),
            vmem_limit_bytes=vmem_limit,
        ),
    )(x2d)


def _softmax_middle(x3: jax.Array) -> jax.Array:
    """Softmax over the middle axis of a (P, K, Q) slab: K on sublanes,
    independent Q lane-dense -> no transposes, unmasked full-lane stores."""
    P, K, Q = x3.shape
    vmem_limit, block_bytes, num_cores = _tpu_params()
    itemsize = jnp.dtype(x3.dtype).itemsize
    tp, tq = _pick_middle_tiles(P, K, Q, itemsize, block_bytes, num_cores)
    grid = (pl.cdiv(P, tp), pl.cdiv(Q, tq))
    return pl.pallas_call(
        _softmax_sublane_kernel,
        out_shape=jax.ShapeDtypeStruct((P, K, Q), x3.dtype),
        grid_spec=pltpu.PrefetchScalarGridSpec(
            num_scalar_prefetch=0,
            grid=grid,
            in_specs=[pl.BlockSpec((tp, K, tq), lambda i, j: (i, 0, j))],
            out_specs=pl.BlockSpec((tp, K, tq), lambda i, j: (i, 0, j)),
        ),
        compiler_params=pltpu.CompilerParams(
            dimension_semantics=("parallel", "parallel"),
            vmem_limit_bytes=vmem_limit,
        ),
    )(x3)


def _sigmoid_1d(x1d: jax.Array) -> jax.Array:
    """Elementwise sigmoid of a 1-D vector. No pad / slice round-trips:
    Pallas masks the ragged tail of the final block."""
    n = x1d.shape[0]
    vmem_limit, block_bytes, num_cores = _tpu_params()
    itemsize = jnp.dtype(x1d.dtype).itemsize
    if n <= _LANE:
        tn = n  # single full-extent block
    else:
        budget = max(_LANE, _round_down(block_bytes // max(1, itemsize), _LANE))
        tn = n if budget >= n else budget
        if num_cores > 1 and tn >= n:
            tn = max(_LANE, _round_down(pl.cdiv(n, 2), _LANE))
    grid = (pl.cdiv(n, tn),)
    return pl.pallas_call(
        _sigmoid_kernel,
        out_shape=jax.ShapeDtypeStruct((n,), x1d.dtype),
        grid_spec=pltpu.PrefetchScalarGridSpec(
            num_scalar_prefetch=0,
            grid=grid,
            in_specs=[pl.BlockSpec((tn,), lambda i: (i,))],
            out_specs=pl.BlockSpec((tn,), lambda i: (i,)),
        ),
        compiler_params=pltpu.CompilerParams(
            dimension_semantics=("parallel",),
            vmem_limit_bytes=vmem_limit,
        ),
    )(x1d)


def softmax_module(x: jax.Array, dim: int) -> jax.Array:
    """Forward pass of SoftMax(dim): softmax along `dim` if x.ndim > 1,
    else elementwise sigmoid (the 1-D branch ignores `dim` by design,
    mirroring the original PyTorch module)."""
    if x.ndim > 1:
        d = dim % x.ndim
        if d == x.ndim - 1:
            lead = x.shape[:-1]
            n = x.shape[-1]
            y2 = _softmax_lastdim(x.reshape(-1, n))
            return y2.reshape(*lead, n)
        # (pre, K, post) view, reduce over the middle -> no HBM transposes.
        p = math.prod(x.shape[:d]) if d > 0 else 1
        k = x.shape[d]
        q = math.prod(x.shape[d + 1:])
        if q >= _LANE:
            y3 = _softmax_middle(x.reshape(p, k, q))
            return y3.reshape(x.shape)
        # Lane-starved trailing extent (< 128): a <Q-wide last dim would force
        # masked partial stores; transpose once and reuse the lane-dense path.
        xt = jnp.moveaxis(x, d, -1)
        yt = _softmax_lastdim(xt.reshape(-1, k)).reshape(xt.shape)
        return jnp.moveaxis(yt, -1, d)
    else:
        return _sigmoid_1d(x)


# ----------------------------- main ----------------------------------------


if __name__ == "__main__":
    key = jax.random.PRNGKey(0)
    k1, k2 = jax.random.split(key)

    # NCHW input, softmax over channel dim (dim=1) -> sublane-reduce path.
    x = jax.random.normal(k1, (2, 4, 16, 16), dtype=jnp.float32)
    dim = 1
    y = jax.block_until_ready(softmax_module(x, dim))

    y_ref = jax.nn.softmax(x, axis=dim)
    assert y.shape == x.shape
    assert jnp.allclose(y, y_ref, atol=1e-6, rtol=1e-6)
    assert jnp.allclose(jnp.sum(y, axis=dim), 1.0, atol=1e-6)

    # Last-dim softmax -> lane-reduce path.
    x_last = jax.random.normal(k2, (8, 256), dtype=jnp.float32)
    y_last = jax.block_until_ready(softmax_module(x_last, -1))
    assert jnp.allclose(y_last, jax.nn.softmax(x_last, axis=-1),
                        atol=1e-6, rtol=1e-6)

    # Lane-starved middle axis (post extent < 128) -> transpose fallback.
    x_small = jax.random.normal(k1, (2, 8, 7, 7), dtype=jnp.float32)
    y_small = jax.block_until_ready(softmax_module(x_small, 1))
    assert jnp.allclose(y_small, jax.nn.softmax(x_small, axis=1),
                        atol=1e-6, rtol=1e-6)

    # 1-D branch -> sigmoid.
    x1 = jax.random.normal(k2, (32,), dtype=jnp.float32)
    y1 = jax.block_until_ready(softmax_module(x1, dim))
    assert jnp.allclose(y1, jax.nn.sigmoid(x1), atol=1e-5, rtol=1e-5)

    print("KERNEL_OK")
</pallas_src>

<mosaic_0001>
module attributes {stable_mosaic.version = 11 : i64} {
  func.func @_softmax_sublane_kernel(%arg0: i32, %arg1: i32, %arg2: memref<2x4x256xf32, #tpu.memory_space<vmem>>, %arg3: memref<2x4x256xf32, #tpu.memory_space<vmem>>) attributes {dimension_semantics = [#tpu.dimension_semantics<parallel>, #tpu.dimension_semantics<parallel>], iteration_bounds = array<i64: 1, 1>, scalar_prefetch = 0 : i64, scratch_operands = 0 : i64, tpu.core_type = #tpu.core_type<tc>, window_params = [{transform_indices = @transform_0, window_bounds = array<i64: 2, 4, 256>}, {transform_indices = @transform_1, window_bounds = array<i64: 2, 4, 256>}]} {
    %c0 = arith.constant 0 : index
    %c0_0 = arith.constant 0 : index
    %c0_1 = arith.constant 0 : index
    %0 = vector.load %arg2[%c0, %c0_0, %c0_1] : memref<2x4x256xf32, #tpu.memory_space<vmem>>, vector<2x4x256xf32>
    %cst = arith.constant dense<0xFF800000> : vector<2x256xf32>
    %1 = vector.multi_reduction <maximumf>, %0, %cst [1] : vector<2x4x256xf32> to vector<2x256xf32>
    %2 = vector.shape_cast %1 : vector<2x256xf32> to vector<2x1x256xf32>
    %3 = vector.broadcast %2 : vector<2x1x256xf32> to vector<2x4x256xf32>
    %4 = arith.subf %0, %3 : vector<2x4x256xf32>
    %5 = math.exp %4 : vector<2x4x256xf32>
    %cst_2 = arith.constant dense<0.000000e+00> : vector<2x256xf32>
    %6 = vector.multi_reduction <add>, %5, %cst_2 [1] : vector<2x4x256xf32> to vector<2x256xf32>
    %7 = vector.shape_cast %6 : vector<2x256xf32> to vector<2x1x256xf32>
    %8 = vector.broadcast %7 : vector<2x1x256xf32> to vector<2x4x256xf32>
    %9 = arith.divf %5, %8 : vector<2x4x256xf32>
    %c0_3 = arith.constant 0 : index
    %c0_4 = arith.constant 0 : index
    %c0_5 = arith.constant 0 : index
    %10 = vector.load %arg3[%c0_3, %c0_4, %c0_5] : memref<2x4x256xf32, #tpu.memory_space<vmem>>, vector<2x4x256xf32>
    tpu.vector_store %arg3[%c0_3, %c0_4, %c0_5], %9 {strides = array<i32>} : memref<2x4x256xf32, #tpu.memory_space<vmem>>, vector<2x4x256xf32>,
    return
  }
  func.func @transform_0(%arg0: i32, %arg1: i32) -> (i32, i32, i32) {
    %c0_i32 = arith.constant 0 : i32
    %c0_i32_0 = arith.constant 0 : i32
    return %arg0, %c0_i32, %arg1 : i32, i32, i32
  }
  func.func @transform_1(%arg0: i32, %arg1: i32) -> (i32, i32, i32) {
    %c0_i32 = arith.constant 0 : i32
    %c0_i32_0 = arith.constant 0 : i32
    return %arg0, %c0_i32, %arg1 : i32, i32, i32
  }
}

</mosaic_0001>

<bundles_post_ra>
// kernel: tpu_custom_call.1
= control target key start
LH: loop header
LB: loop body
LE: loop exit
PB: predicated region body
PF: predicated region fallthrough
CT: control target
= control target key end

     0   :  { %6 = vsyncpa [#allocation3], 0  ;;  %s253_s0 = inlined_call_operand.hbm [shape: f32[2,4,256], index: 0, kind: input, shape index: {}]   ;;  %s254_s1 = inlined_call_operand.hbm [shape: f32[2,4,256], index: 1, kind: output, shape index: {}]  }
   0x1   :  { %7 = vsyncpa [#allocation4], 0  ;;  %s201_s6 = smov [#allocation2]   ;;  %s153_s10 = scalar_lea.hbm %s253_s0, 256 }
   0x2   :  { %s13_s7 = sshll.u32 %s201_s6, 4  ;;  %p154_p0 = scmp.ne.s32.totalorder %s253_s0, %s153_s10  ;;  %s14_s7 = int_to_ptr.vmem [resolvable:$true] %s13_s7 }
   0x3   :  { %p157_p1 = scmp.lt.u32.totalorder %s153_s10, %s253_s0 }
   0x5   :  { %p159_p2 = pnand %p157_p1, %p154_p0 }
   0x7   :  { %162 = shalt.err (!%p159_p2)
}
   0x8   :  { %s163_s15 = scalar_lea.vmem %s14_s7, 256  ;;  %p168_p4 = scmp.lt.s32.totalorder %s14_s7, %s14_s7 }
   0x9   :  { %p164_p3 = scmp.ne.s32.totalorder %s14_s7, %s163_s15  ;;  %p169_p5 = scmp.lt.s32.totalorder %s163_s15, %s163_s15 }
   0xb   :  { %p170_p6 = por %p169_p5, %p168_p4 }
   0xd   :  { %p171_p7 = pnand %p170_p6, %p164_p3 }
   0xf   :  { %174 = shalt.err (!%p171_p7)
}
  0x10   :  { %s202_s16 = smov 128   ;;  %s203_s17 = smov 8  }
  0x11   :  { %19 = dma.hbm_to_vmem [thread:$0]  %s253_s0, 256, %s14_s7, [#allocation3], %s202_s16, %s202_s16, %s203_s17  }
  0x12   :  { %197 = dma.done.wait [#allocation3], 256  }
  0x13   :  { %198 = vsyncadd [#allocation3], 4294967040  ;;  %vm31_vm0 = vcmask 1043456   ;;  %v23_v0 = vld [vmem:[#allocation2] sm:$0xff]  ;;  %v24_v1 = vld [vmem:[#allocation2 + $0x8] sm:$0xff]  ;;  %s204_s0 = smov [#allocation5]  }
  0x14   :  { %v27_v2 = vcombine.high %v23_v0, %v23_v0  ;;  %v32_v3 = vsel %vm31_vm0, %v23_v0, -inf  ;;  %v28_v4 = vcombine.high %v24_v1, %v24_v1  ;;  %v46_v5 = vsel %vm31_vm0, %v24_v1, -inf  ;;  %s127_s20 = sshll.u32 %s204_s0, 4  ;;  %s128_s20 = int_to_ptr.vmem [resolvable:$true] %s127_s20 }
  0x15   :  { %v33_v6 = vrot.slane %v32_v3, 4  ;;  %v47_v7 = vrot.slane %v46_v5, 4  ;;  %s175_s21 = scalar_lea.vmem %s128_s20, 256  ;;  %p180_p9 = scmp.lt.s32.totalorder %s128_s20, %s128_s20 }
  0x16   :  { %v39_v8 = vsel %vm31_vm0, %v27_v2, -inf  ;;  %v53_v9 = vsel %vm31_vm0, %v28_v4, -inf  ;;  %p176_p8 = scmp.ne.s32.totalorder %s128_s20, %s175_s21  ;;  %p181_p10 = scmp.lt.s32.totalorder %s175_s21, %s175_s21 }
  0x17   :  { %v34_v10 = vmax.f32 %v32_v3, %v33_v6  ;;  %v40_v11 = vrot.slane %v39_v8, 4  ;;  %v48_v12 = vmax.f32 %v46_v5, %v47_v7  ;;  %v54_v13 = vrot.slane %v53_v9, 4 }
  0x18   :  { %p182_p11 = por %p181_p10, %p180_p9 }
  0x19   :  { %v35_v14 = vrot.slane %v34_v10, 2  ;;  %v41_v15 = vmax.f32 %v39_v8, %v40_v11  ;;  %v49_v16 = vrot.slane %v48_v12, 2  ;;  %v55_v17 = vmax.f32 %v53_v9, %v54_v13 }
  0x1a   :  { %p183_p12 = pnand %p182_p11, %p176_p8 }
  0x1b   :  { %v36_v18 = vmax.f32 %v34_v10, %v35_v14  ;;  %v42_v19 = vrot.slane %v41_v15, 2  ;;  %v50_v20 = vmax.f32 %v48_v12, %v49_v16  ;;  %v56_v21 = vrot.slane %v55_v17, 2 }
  0x1d   :  { %v37_v22 = vrot.slane %v36_v18, 1  ;;  %v43_v23 = vmax.f32 %v41_v15, %v42_v19  ;;  %v51_v24 = vrot.slane %v50_v20, 1  ;;  %v57_v25 = vmax.f32 %v55_v17, %v56_v21 }
  0x1f   :  { %v38_v26 = vmax.f32 %v36_v18, %v37_v22  ;;  %v44_v27 = vrot.slane %v43_v23, 1  ;;  %v52_v28 = vmax.f32 %v50_v20, %v51_v24  ;;  %v58_v29 = vrot.slane %v57_v25, 1 }
  0x21   :  { %v45_v30 = vmax.f32 %v43_v23, %v44_v27  ;;  %v59_v31 = vmax.f32 %v57_v25, %v58_v29 }
  0x23   :  { %v64_v32 = vcombine.low %v38_v26, %v45_v30  ;;  %v65_v33 = vcombine.low %v52_v28, %v59_v31 }
  0x25   :  { %v68_v34 = vsub.f32 %v23_v0, %v64_v32  ;;  %v69_v35 = vsub.f32 %v24_v1, %v65_v33 }
  0x27   :  { %v70_v36 = vmul.f32 1.442695, %v68_v34  ;;  %v72_v37 = vmul.f32 1.442695, %v69_v35 }
  0x29   :  { %145 = vpow2.f32 %v70_v36 }
  0x2a   :  { %147 = vpow2.f32 %v72_v37 }
  0x33   :  { %v146_v38 = vpop.eup %145 }
  0x34   :  { %v148_v39 = vpop.eup %147  ;;  %v76_v40 = vcombine.high %v146_v38, %v146_v38  ;;  %v80_v41 = vsel %vm31_vm0, %v146_v38, 0.0 }
  0x35   :  { %v81_v42 = vrot.slane %v80_v41, 4  ;;  %v77_v43 = vcombine.high %v148_v39, %v148_v39  ;;  %v94_v44 = vsel %vm31_vm0, %v148_v39, 0.0 }
  0x36   :  { %v87_v45 = vsel %vm31_vm0, %v76_v40, 0.0  ;;  %v95_v46 = vrot.slane %v94_v44, 4 }
  0x37   :  { %v82_v47 = vadd.f32 %v81_v42, %v80_v41  ;;  %v88_v48 = vrot.slane %v87_v45, 4  ;;  %v101_v49 = vsel %vm31_vm0, %v77_v43, 0.0 }
  0x38   :  { %v96_v50 = vadd.f32 %v95_v46, %v94_v44  ;;  %v102_v51 = vrot.slane %v101_v49, 4 }
  0x39   :  { %v83_v52 = vrot.slane %v82_v47, 2  ;;  %v89_v53 = vadd.f32 %v88_v48, %v87_v45 }
  0x3a   :  { %v97_v54 = vrot.slane %v96_v50, 2  ;;  %v103_v55 = vadd.f32 %v102_v51, %v101_v49 }
  0x3b   :  { %v84_v56 = vadd.f32 %v83_v52, %v82_v47  ;;  %v90_v57 = vrot.slane %v89_v53, 2 }
  0x3c   :  { %v98_v58 = vadd.f32 %v97_v54, %v96_v50  ;;  %v104_v59 = vrot.slane %v103_v55, 2 }
  0x3d   :  { %v85_v60 = vrot.slane %v84_v56, 1  ;;  %v91_v61 = vadd.f32 %v90_v57, %v89_v53 }
  0x3e   :  { %v99_v62 = vrot.slane %v98_v58, 1  ;;  %v105_v63 = vadd.f32 %v104_v59, %v103_v55 }
  0x3f   :  { %v86_v0 = vadd.f32 %v85_v60, %v84_v56  ;;  %v92_v1 = vrot.slane %v91_v61, 1 }
  0x40   :  { %v100_v2 = vadd.f32 %v99_v62, %v98_v58  ;;  %v106_v3 = vrot.slane %v105_v63, 1 }
  0x41   :  { %v93_v4 = vadd.f32 %v92_v1, %v91_v61 }
  0x42   :  { %v107_v5 = vadd.f32 %v106_v3, %v105_v63 }
  0x43   :  { %v112_v6 = vcombine.low %v86_v0, %v93_v4 }
  0x44   :  { %v113_v7 = vcombine.low %v100_v2, %v107_v5 }
  0x45   :  { %149 = vrcp.f32 %v112_v6 }
  0x46   :  { %151 = vrcp.f32 %v113_v7 }
  0x4f   :  { %v150_v8 = vpop.eup %149 }
  0x50   :  { %v152_v9 = vpop.eup %151  ;;  %v117_v10 = vmul.f32 %v150_v8, %v146_v38 }
  0x51   :  { %v119_v11 = vmul.f32 %v152_v9, %v148_v39 }
  0x52   :  { %120 = vst [vmem:[#allocation5] sm:$0xff] %v117_v10 }
  0x53   :  { %121 = vst [vmem:[#allocation5 + $0x8] sm:$0xff] %v119_v11 }
  0x54   :  { %186 = shalt.err (!%p183_p12)
}
  0x55   :  { %s187_s24 = scalar_lea.hbm %s254_s1, 256 }
  0x56   :  { %p188_p13 = scmp.ne.s32.totalorder %s254_s1, %s187_s24  ;;  %p191_p0 = scmp.lt.u32.totalorder %s187_s24, %s254_s1 }
  0x58   :  { %p193_p1 = pnand %p191_p0, %p188_p13 }
  0x5a   :  { %196 = shalt.err (!%p193_p1)
}
  0x5b   :  { %133 = dma.vmem_to_hbm [thread:$0]  %s128_s20, 256, %s254_s1, [#allocation4], %s202_s16, %s202_s16, %s203_s17  }
  0x5c   :  { %199 = dma.done.wait [#allocation4], 256  }
  0x5d   :  { %200 = vsyncadd [#allocation4], 4294967040 }
  0x5e   :  { %137 = vsyncpa [#allocation3], 1 }
  0x5f   :  { %138 = vsyncpa [#allocation4], 1 }

</bundles_post_ra>
